<compile_context>
chip_gen: v6e
topology: v6e:2x2x1
jax: 0.10.0
libtpu: 0.0.40
codegen_flags: <defaults>
</compile_context>

<pallas_src>
import functools

import jax
import jax.numpy as jnp
from jax.experimental import pallas as pl
from jax.experimental.pallas import tpu as pltpu


def rnn_kernel(x_ref, params_ref, w_hhT_ref, b2_ref, y_ref, *, bf16_carry):
    # x_ref:      (B, T)  f32 VMEM   (input_size == 1, squeezed)
    # params_ref: (8, H)  f32 VMEM   row0 = w_ih row, row1 = b_ih + b_hh,
    #                                row2 = w2 row, rows 3..7 = 0 (padding)
    # w_hhT_ref:  (H, H)  bf16 VMEM  hidden->hidden weight, transposed
    # b2_ref:     (1,)    f32 SMEM   output-linear bias (scalar)
    # y_ref:      (B, 1)  f32 VMEM   output
    B, T = x_ref.shape

    w_row = params_ref[0:1, :]          # (1, H) input->hidden weight (in_dim==1)
    b_row = params_ref[1:2, :]          # (1, H) b_ih + b_hh
    w2_row = params_ref[2:3, :]         # (1, H) output linear weight row

    x_bt = x_ref[...]                   # (B, T) f32

    cdt = jnp.bfloat16 if bf16_carry else jnp.float32

    # --- hoisted input projection (off the serial chain) --------------------
    # Valid only because input_size == 1 (matches nn.RNN(1, H)); use a real dot
    # if the input width ever changes.
    pre = [(x_bt[:, t:t + 1] * w_row + b_row).astype(cdt) for t in range(T)]

    w_hhT = w_hhT_ref[...]              # (H, H) bf16, stays resident

    # --- fully unrolled tanh recurrence (T static & small) ------------------
    h = jnp.zeros((B, w_hhT.shape[0]), cdt)
    for t in range(T):
        if bf16_carry:
            # bf16 operands, bf16 pop, bf16 add + tanh: no per-step pack on the
            # dependent chain (v6e/v7x have bf16 VPU + EUP).
            hh = jnp.dot(h, w_hhT, preferred_element_type=jnp.bfloat16)
        else:
            # v5e-safe shape: bf16 MXU operands only, f32 everything else.
            hh = jnp.dot(h.astype(jnp.bfloat16), w_hhT,
                         preferred_element_type=jnp.float32)
        h = jnp.tanh(pre[t] + hh)

    # --- final Linear(H, 1): VPU multiply + lane reduce (no N=1 MXU matmul) --
    hf = h.astype(jnp.float32)
    y_ref[...] = jnp.sum(hf * w2_row, axis=-1, keepdims=True) + b2_ref[0]


def rnn_forward(x, w_ih, w_hh, b_ih, b_hh, w2, b2, *, bf16_carry=None):
    """x: (B, T, 1) batch-first, like the PyTorch module. Returns (B, 1)."""
    B, T, in_dim = x.shape
    assert in_dim == 1, "kernel's input projection assumes input_size == 1"
    H = w_hh.shape[0]

    if bf16_carry is None:
        kind = jax.devices()[0].device_kind.lower()
        # bf16 VPU/EUP exist on v6e / v7x; stay f32 on v5e/v5p/v4.
        bf16_carry = any(tag in kind for tag in ("v6", "v7", "7x"))

    # 2-D, lane-dense-ish x: one padded tile instead of T slabs.
    x2d = x[..., 0].astype(jnp.float32)                          # (B, T)

    # Pack the tiny parameter vectors into a single (8, H) f32 slab.
    params = jnp.zeros((8, H), jnp.float32)
    params = params.at[0].set(w_ih[:, 0].astype(jnp.float32))    # w_ih row
    params = params.at[1].set((b_ih + b_hh).astype(jnp.float32)) # fused bias
    params = params.at[2].set(w2[0, :].astype(jnp.float32))      # output weight

    w_hhT = w_hh.T.astype(jnp.bfloat16)                          # (H, H) bf16
    b2r = b2.reshape(1).astype(jnp.float32)                      # (1,) scalar

    vmem = pl.BlockSpec(memory_space=pltpu.MemorySpace.VMEM)
    smem = pl.BlockSpec(memory_space=pltpu.MemorySpace.SMEM)

    kernel = functools.partial(rnn_kernel, bf16_carry=bf16_carry)
    return pl.pallas_call(
        kernel,
        out_shape=jax.ShapeDtypeStruct((B, 1), jnp.float32),
        in_specs=[vmem, vmem, vmem, smem],
        out_specs=vmem,
    )(x2d, params, w_hhT, b2r)


def _reference_f32(x, w_ih, w_hh, b_ih, b_hh, w2, b2):
    # Exact f32 semantics of the PyTorch module.
    B, T, _ = x.shape
    H = w_hh.shape[0]
    h = jnp.zeros((B, H), jnp.float32)
    for t in range(T):
        h = jnp.tanh(x[:, t, :] @ w_ih.T + b_ih + h @ w_hh.T + b_hh)
    return h @ w2.T + b2


def _reference_matched(x, w_ih, w_hh, b_ih, b_hh, w2, b2, bf16_carry):
    # Same recurrence, with the same reduced-precision choices the kernel makes.
    B, T, _ = x.shape
    H = w_hh.shape[0]
    cdt = jnp.bfloat16 if bf16_carry else jnp.float32
    w_hhT = w_hh.T.astype(jnp.bfloat16)
    bias = b_ih + b_hh
    h = jnp.zeros((B, H), cdt)
    for t in range(T):
        pre_t = (x[:, t, :] * w_ih.T + bias).astype(cdt)
        if bf16_carry:
            hh = jnp.dot(h, w_hhT, preferred_element_type=jnp.bfloat16)
        else:
            hh = jnp.dot(h.astype(jnp.bfloat16), w_hhT,
                         preferred_element_type=jnp.float32)
        h = jnp.tanh(pre_t + hh)
    hf = h.astype(jnp.float32)
    return jnp.sum(hf * w2[0, :], axis=-1, keepdims=True) + b2


if __name__ == "__main__":
    B, T, H = 2, 8, 32

    key = jax.random.PRNGKey(0)
    k_x, k_ih, k_hh, k_bih, k_bhh, k_w2, k_b2 = jax.random.split(key, 7)

    # Deterministic parameter init matching the module's __init__ shapes.
    # xavier_normal_ for weight_ih_l0: std = sqrt(2 / (fan_in + fan_out))
    w_ih = jax.random.normal(k_ih, (H, 1), jnp.float32) * jnp.sqrt(2.0 / (1 + H))
    # orthogonal_ for weight_hh_l0
    w_hh = jax.nn.initializers.orthogonal()(k_hh, (H, H), jnp.float32)
    # PyTorch default RNN/Linear biases: uniform(-1/sqrt(H), 1/sqrt(H))
    bound = 1.0 / jnp.sqrt(H)
    b_ih = jax.random.uniform(k_bih, (H,), jnp.float32, -bound, bound)
    b_hh = jax.random.uniform(k_bhh, (H,), jnp.float32, -bound, bound)
    w2 = jax.random.uniform(k_w2, (1, H), jnp.float32, -bound, bound)
    b2 = jax.random.uniform(k_b2, (1,), jnp.float32, -bound, bound)

    x = jax.random.normal(k_x, (B, T, 1), jnp.float32)

    kind = jax.devices()[0].device_kind.lower()
    bf16_carry = any(tag in kind for tag in ("v6", "v7", "7x"))

    y = rnn_forward(x, w_ih, w_hh, b_ih, b_hh, w2, b2, bf16_carry=bf16_carry)
    y = jax.block_until_ready(y)
    assert y.shape == (B, 1)

    # Check vs. a reference that makes the same reduced-precision choices as the
    # kernel (verifies the kernel computes exactly what we intend).
    y_match = _reference_matched(x, w_ih, w_hh, b_ih, b_hh, w2, b2, bf16_carry)
    tight = 4e-2 if bf16_carry else 2e-3
    assert jnp.allclose(y, y_match, atol=tight, rtol=tight)

    # Loose check vs. full-f32 PyTorch-module semantics: bf16 MXU operands (and
    # the bf16 carry on v6e/v7x) perturb the recurrence by O(1e-3..1e-2) here.
    y_f32 = _reference_f32(x, w_ih, w_hh, b_ih, b_hh, w2, b2)
    loose = 1e-1 if bf16_carry else 5e-2
    assert jnp.allclose(y, y_f32, atol=loose, rtol=loose)

    print("KERNEL_OK")
</pallas_src>

<mosaic_0001>
module attributes {stable_mosaic.version = 11 : i64} {
  func.func @rnn_kernel(%arg0: memref<2x8xf32, #tpu.memory_space<vmem>>, %arg1: memref<8x32xf32, #tpu.memory_space<vmem>>, %arg2: memref<32x32xbf16, #tpu.memory_space<vmem>>, %arg3: memref<1xf32, #tpu.memory_space<smem>>, %arg4: memref<2x1xf32, #tpu.memory_space<vmem>>) attributes {dimension_semantics = [], scalar_prefetch = 0 : i64, scratch_operands = 0 : i64, tpu.core_type = #tpu.core_type<tc>} {
    %c0 = arith.constant 0 : index
    %c0_0 = arith.constant 0 : index
    %0 = vector.load %arg1[%c0, %c0_0] : memref<8x32xf32, #tpu.memory_space<vmem>>, vector<1x32xf32>
    %c1 = arith.constant 1 : index
    %c0_1 = arith.constant 0 : index
    %1 = vector.load %arg1[%c1, %c0_1] : memref<8x32xf32, #tpu.memory_space<vmem>>, vector<1x32xf32>
    %c2 = arith.constant 2 : index
    %c0_2 = arith.constant 0 : index
    %2 = vector.load %arg1[%c2, %c0_2] : memref<8x32xf32, #tpu.memory_space<vmem>>, vector<1x32xf32>
    %c0_3 = arith.constant 0 : index
    %c0_4 = arith.constant 0 : index
    %3 = vector.load %arg0[%c0_3, %c0_4] : memref<2x8xf32, #tpu.memory_space<vmem>>, vector<2x8xf32>
    %4 = vector.extract_strided_slice %3 {offsets = [0, 0], sizes = [2, 1], strides = [1, 1]} : vector<2x8xf32> to vector<2x1xf32>
    %5 = vector.broadcast %4 : vector<2x1xf32> to vector<2x32xf32>
    %6 = vector.broadcast %0 : vector<1x32xf32> to vector<2x32xf32>
    %7 = arith.mulf %5, %6 : vector<2x32xf32>
    %8 = vector.broadcast %1 : vector<1x32xf32> to vector<2x32xf32>
    %9 = arith.addf %7, %8 : vector<2x32xf32>
    %10 = vector.extract_strided_slice %3 {offsets = [0, 1], sizes = [2, 1], strides = [1, 1]} : vector<2x8xf32> to vector<2x1xf32>
    %11 = vector.broadcast %10 : vector<2x1xf32> to vector<2x32xf32>
    %12 = vector.broadcast %0 : vector<1x32xf32> to vector<2x32xf32>
    %13 = arith.mulf %11, %12 : vector<2x32xf32>
    %14 = vector.broadcast %1 : vector<1x32xf32> to vector<2x32xf32>
    %15 = arith.addf %13, %14 : vector<2x32xf32>
    %16 = vector.extract_strided_slice %3 {offsets = [0, 2], sizes = [2, 1], strides = [1, 1]} : vector<2x8xf32> to vector<2x1xf32>
    %17 = vector.broadcast %16 : vector<2x1xf32> to vector<2x32xf32>
    %18 = vector.broadcast %0 : vector<1x32xf32> to vector<2x32xf32>
    %19 = arith.mulf %17, %18 : vector<2x32xf32>
    %20 = vector.broadcast %1 : vector<1x32xf32> to vector<2x32xf32>
    %21 = arith.addf %19, %20 : vector<2x32xf32>
    %22 = vector.extract_strided_slice %3 {offsets = [0, 3], sizes = [2, 1], strides = [1, 1]} : vector<2x8xf32> to vector<2x1xf32>
    %23 = vector.broadcast %22 : vector<2x1xf32> to vector<2x32xf32>
    %24 = vector.broadcast %0 : vector<1x32xf32> to vector<2x32xf32>
    %25 = arith.mulf %23, %24 : vector<2x32xf32>
    %26 = vector.broadcast %1 : vector<1x32xf32> to vector<2x32xf32>
    %27 = arith.addf %25, %26 : vector<2x32xf32>
    %28 = vector.extract_strided_slice %3 {offsets = [0, 4], sizes = [2, 1], strides = [1, 1]} : vector<2x8xf32> to vector<2x1xf32>
    %29 = vector.broadcast %28 : vector<2x1xf32> to vector<2x32xf32>
    %30 = vector.broadcast %0 : vector<1x32xf32> to vector<2x32xf32>
    %31 = arith.mulf %29, %30 : vector<2x32xf32>
    %32 = vector.broadcast %1 : vector<1x32xf32> to vector<2x32xf32>
    %33 = arith.addf %31, %32 : vector<2x32xf32>
    %34 = vector.extract_strided_slice %3 {offsets = [0, 5], sizes = [2, 1], strides = [1, 1]} : vector<2x8xf32> to vector<2x1xf32>
    %35 = vector.broadcast %34 : vector<2x1xf32> to vector<2x32xf32>
    %36 = vector.broadcast %0 : vector<1x32xf32> to vector<2x32xf32>
    %37 = arith.mulf %35, %36 : vector<2x32xf32>
    %38 = vector.broadcast %1 : vector<1x32xf32> to vector<2x32xf32>
    %39 = arith.addf %37, %38 : vector<2x32xf32>
    %40 = vector.extract_strided_slice %3 {offsets = [0, 6], sizes = [2, 1], strides = [1, 1]} : vector<2x8xf32> to vector<2x1xf32>
    %41 = vector.broadcast %40 : vector<2x1xf32> to vector<2x32xf32>
    %42 = vector.broadcast %0 : vector<1x32xf32> to vector<2x32xf32>
    %43 = arith.mulf %41, %42 : vector<2x32xf32>
    %44 = vector.broadcast %1 : vector<1x32xf32> to vector<2x32xf32>
    %45 = arith.addf %43, %44 : vector<2x32xf32>
    %46 = vector.extract_strided_slice %3 {offsets = [0, 7], sizes = [2, 1], strides = [1, 1]} : vector<2x8xf32> to vector<2x1xf32>
    %47 = vector.broadcast %46 : vector<2x1xf32> to vector<2x32xf32>
    %48 = vector.broadcast %0 : vector<1x32xf32> to vector<2x32xf32>
    %49 = arith.mulf %47, %48 : vector<2x32xf32>
    %50 = vector.broadcast %1 : vector<1x32xf32> to vector<2x32xf32>
    %51 = arith.addf %49, %50 : vector<2x32xf32>
    %c0_5 = arith.constant 0 : index
    %c0_6 = arith.constant 0 : index
    %52 = vector.load %arg2[%c0_5, %c0_6] : memref<32x32xbf16, #tpu.memory_space<vmem>>, vector<32x32xbf16>
    %cst = arith.constant 0.000000e+00 : f32
    %53 = vector.broadcast %cst : f32 to vector<2x32xf32>
    %54 = arith.truncf %53 : vector<2x32xf32> to vector<2x32xbf16>
    %cst_7 = arith.constant dense<0.000000e+00> : vector<2x32xf32>
    %55 = tpu.matmul %54, %52, %cst_7 {dimension_numbers = #tpu.dot_dimension_numbers<[1], [0], [0], [1], [0, 0, 1, 1], [], []>} : vector<2x32xbf16>, vector<32x32xbf16>, vector<2x32xf32> -> vector<2x32xf32>
    %56 = arith.addf %9, %55 : vector<2x32xf32>
    %57 = math.tanh %56 : vector<2x32xf32>
    %58 = arith.truncf %57 : vector<2x32xf32> to vector<2x32xbf16>
    %cst_8 = arith.constant dense<0.000000e+00> : vector<2x32xf32>
    %59 = tpu.matmul %58, %52, %cst_8 {dimension_numbers = #tpu.dot_dimension_numbers<[1], [0], [0], [1], [0, 0, 1, 1], [], []>} : vector<2x32xbf16>, vector<32x32xbf16>, vector<2x32xf32> -> vector<2x32xf32>
    %60 = arith.addf %15, %59 : vector<2x32xf32>
    %61 = math.tanh %60 : vector<2x32xf32>
    %62 = arith.truncf %61 : vector<2x32xf32> to vector<2x32xbf16>
    %cst_9 = arith.constant dense<0.000000e+00> : vector<2x32xf32>
    %63 = tpu.matmul %62, %52, %cst_9 {dimension_numbers = #tpu.dot_dimension_numbers<[1], [0], [0], [1], [0, 0, 1, 1], [], []>} : vector<2x32xbf16>, vector<32x32xbf16>, vector<2x32xf32> -> vector<2x32xf32>
    %64 = arith.addf %21, %63 : vector<2x32xf32>
    %65 = math.tanh %64 : vector<2x32xf32>
    %66 = arith.truncf %65 : vector<2x32xf32> to vector<2x32xbf16>
    %cst_10 = arith.constant dense<0.000000e+00> : vector<2x32xf32>
    %67 = tpu.matmul %66, %52, %cst_10 {dimension_numbers = #tpu.dot_dimension_numbers<[1], [0], [0], [1], [0, 0, 1, 1], [], []>} : vector<2x32xbf16>, vector<32x32xbf16>, vector<2x32xf32> -> vector<2x32xf32>
    %68 = arith.addf %27, %67 : vector<2x32xf32>
    %69 = math.tanh %68 : vector<2x32xf32>
    %70 = arith.truncf %69 : vector<2x32xf32> to vector<2x32xbf16>
    %cst_11 = arith.constant dense<0.000000e+00> : vector<2x32xf32>
    %71 = tpu.matmul %70, %52, %cst_11 {dimension_numbers = #tpu.dot_dimension_numbers<[1], [0], [0], [1], [0, 0, 1, 1], [], []>} : vector<2x32xbf16>, vector<32x32xbf16>, vector<2x32xf32> -> vector<2x32xf32>
    %72 = arith.addf %33, %71 : vector<2x32xf32>
    %73 = math.tanh %72 : vector<2x32xf32>
    %74 = arith.truncf %73 : vector<2x32xf32> to vector<2x32xbf16>
    %cst_12 = arith.constant dense<0.000000e+00> : vector<2x32xf32>
    %75 = tpu.matmul %74, %52, %cst_12 {dimension_numbers = #tpu.dot_dimension_numbers<[1], [0], [0], [1], [0, 0, 1, 1], [], []>} : vector<2x32xbf16>, vector<32x32xbf16>, vector<2x32xf32> -> vector<2x32xf32>
    %76 = arith.addf %39, %75 : vector<2x32xf32>
    %77 = math.tanh %76 : vector<2x32xf32>
    %78 = arith.truncf %77 : vector<2x32xf32> to vector<2x32xbf16>
    %cst_13 = arith.constant dense<0.000000e+00> : vector<2x32xf32>
    %79 = tpu.matmul %78, %52, %cst_13 {dimension_numbers = #tpu.dot_dimension_numbers<[1], [0], [0], [1], [0, 0, 1, 1], [], []>} : vector<2x32xbf16>, vector<32x32xbf16>, vector<2x32xf32> -> vector<2x32xf32>
    %80 = arith.addf %45, %79 : vector<2x32xf32>
    %81 = math.tanh %80 : vector<2x32xf32>
    %82 = arith.truncf %81 : vector<2x32xf32> to vector<2x32xbf16>
    %cst_14 = arith.constant dense<0.000000e+00> : vector<2x32xf32>
    %83 = tpu.matmul %82, %52, %cst_14 {dimension_numbers = #tpu.dot_dimension_numbers<[1], [0], [0], [1], [0, 0, 1, 1], [], []>} : vector<2x32xbf16>, vector<32x32xbf16>, vector<2x32xf32> -> vector<2x32xf32>
    %84 = arith.addf %51, %83 : vector<2x32xf32>
    %85 = math.tanh %84 : vector<2x32xf32>
    %86 = vector.broadcast %2 : vector<1x32xf32> to vector<2x32xf32>
    %87 = arith.mulf %85, %86 : vector<2x32xf32>
    %cst_15 = arith.constant dense<0.000000e+00> : vector<2xf32>
    %88 = vector.multi_reduction <add>, %87, %cst_15 [1] : vector<2x32xf32> to vector<2xf32>
    %89 = vector.shape_cast %88 : vector<2xf32> to vector<2x1xf32>
    %c0_16 = arith.constant 0 : index
    %90 = memref.load %arg3[%c0_16] : memref<1xf32, #tpu.memory_space<smem>>
    %91 = vector.broadcast %90 : f32 to vector<2x1xf32>
    %92 = arith.addf %89, %91 : vector<2x1xf32>
    %c0_17 = arith.constant 0 : index
    %c0_18 = arith.constant 0 : index
    %93 = vector.load %arg4[%c0_17, %c0_18] : memref<2x1xf32, #tpu.memory_space<vmem>>, vector<2x1xf32>
    tpu.vector_store %arg4[%c0_17, %c0_18], %92 {strides = array<i32>} : memref<2x1xf32, #tpu.memory_space<vmem>>, vector<2x1xf32>,
    return
  }
}

</mosaic_0001>

<bundles_post_ra>
// kernel: tpu_custom_call.1
= control target key start
LH: loop header
LB: loop body
LE: loop exit
PB: predicated region body
PF: predicated region fallthrough
CT: control target
= control target key end

     0   :  { %10 = vsyncpa [#allocation4], 0  ;;  %s838_s0 = inlined_call_operand.vmem [shape: f32[2,8], index: 0, kind: input, shape index: {}]   ;;  %s839_s1 = inlined_call_operand.hbm [shape: f32[8,32], index: 1, kind: input, shape index: {}]   ;;  %s840_s2 = inlined_call_operand.hbm [shape: bf16[32,32], index: 2, kind: input, shape index: {}]   ;;  %s841_s3 = inlined_call_operand.<no memory space> [shape: f32[1], index: 3, kind: input, shape index: {}]   ;;  %s842_s4 = inlined_call_operand.vmem [shape: f32[2,1], index: 4, kind: output, shape index: {}]  }
   0x1   :  { %11 = vsyncpa [#allocation6], 0  ;;  %s695_s15 = smov [#allocation3]   ;;  %s696_s17 = smov [#allocation5]  }
   0x2   :  { %s20_s16 = sshll.u32 %s695_s15, 4  ;;  %s29_s18 = sshll.u32 %s696_s17, 4  ;;  %s21_s16 = int_to_ptr.vmem [resolvable:$true] %s20_s16  ;;  %s30_s18 = int_to_ptr.vmem [resolvable:$true] %s29_s18 }
   0x3   :  { %s659_s19 = scalar_lea.vmem %s21_s16, 128  ;;  %p664_p1 = scmp.lt.s32.totalorder %s21_s16, %s21_s16 }
   0x4   :  { %p660_p0 = scmp.ne.s32.totalorder %s21_s16, %s659_s19  ;;  %p665_p2 = scmp.lt.s32.totalorder %s659_s19, %s659_s19 }
   0x6   :  { %p666_p3 = por %p665_p2, %p664_p1 }
   0x8   :  { %p667_p4 = pnand %p666_p3, %p660_p0 }
   0xa   :  { %670 = shalt.err (!%p667_p4)
}
   0xb   :  { %23 = dma.hbm_to_vmem [thread:$0]  %s839_s1, 128, %s21_s16, [#allocation4]  }
   0xc   :  { %s679_s22 = scalar_lea.vmem %s30_s18, 256  ;;  %p684_p6 = scmp.lt.s32.totalorder %s30_s18, %s30_s18 }
   0xd   :  { %p680_p5 = scmp.ne.s32.totalorder %s30_s18, %s679_s22  ;;  %p685_p7 = scmp.lt.s32.totalorder %s679_s22, %s679_s22 }
   0xf   :  { %p686_p8 = por %p685_p7, %p684_p6 }
  0x11   :  { %p687_p9 = pnand %p686_p8, %p680_p5 }
  0x13   :  { %690 = shalt.err (!%p687_p9)
}
  0x14   :  { %s697_s23 = smov 64   ;;  %s698_s24 = smov 4  }
  0x15   :  { %35 = dma.hbm_to_vmem [thread:$0]  %s840_s2, 256, %s30_s18, [#allocation6], %s697_s23, %s697_s23, %s698_s24  }
  0x16   :  { %691 = dma.done.wait [#allocation4], 128  }
  0x17   :  { %692 = vsyncadd [#allocation4], 4294967168 }
  0x18   :  { %693 = dma.done.wait [#allocation6], 256  }
  0x19   :  { %694 = vsyncadd [#allocation6], 4294967040  ;;  %v699_v0 = vmov 0.0   ;;  %vm700_vm0 = vmmov 0   ;;  %v701_v1 = vmov 0   ;;  %v746_v2 = vld [vmem:[#allocation5 + $0x8] sm:$0xff]  }
  0x1a   :  { %546 = vmatprep.subr.bf16.mxu0 %v699_v0  ;;  %550 = vmatprep.mubr.msk.bf16.mxu0 %vm700_vm0, %v699_v0  ;;  %v749_v3 = vld [vmem:[#allocation5] sm:$0xff]   ;;  %v754_v4 = vld [vmem:[%s838_s0] sm:$0x3]  ;;  %v702_v5 = vmov 1   ;;  %vm122_vm1 = vcmask 261120   ;;  %v703_v18 = vmov 2  }
  0x1b   :  { %624 = vset.pattern.permute.xlu0 %v701_v1  ;;  %554 = vmatprep.subr.bf16.mxu1 %v699_v0  ;;  %v771_v7 = vld [vmem:[#allocation3] ss:$0 sm:$0xff]  ;;  %v774_v9 = vld [vmem:[#allocation3 + $0x1] ss:$0 sm:$0xff]  ;;  %v704_v29 = vmov 3   ;;  %v705_v40 = vmov 4  }
  0x1c   :  { %558 = vmatprep.mubr.msk.bf16.mxu1 %vm700_vm0, %v699_v0  ;;  %547 = vmatpush3.bf16.msra.mxu0 %v746_v2  ;;  %v706_v51 = vmov 5   ;;  %v707_v62 = vmov 6   ;;  %vm495_vm2 = vcmask 254976   ;;  %vm502_vm3 = vcmask 1024  }
  0x1d   :  { %555 = vmatpush3.bf16.msra.mxu1 %v746_v2  ;;  %548 = vmatprep.subr.bf16.mxu0 %v699_v0 }
  0x1e   :  { %51 = vperm.xlu0 %624, %v754_v4   ;;  %556 = vmatprep.subr.bf16.mxu1 %v699_v0 }
  0x1f   :  { %626 = vset.pattern.permute.xlu1 %v703_v18 }
  0x20   :  { %549 = vmatpush3.bf16.msra.mxu0 %v749_v3  ;;  %71 = vperm.xlu1 %626, %v754_v4  }
  0x21   :  { %557 = vmatpush3.bf16.msra.mxu1 %v749_v3  ;;  %562 = vmatprep.subr.bf16.mxu0 %v699_v0 }
  0x22   :  { %570 = vmatprep.subr.bf16.mxu1 %v699_v0  ;;  %625 = vset.pattern.permute.xlu0 %v702_v5 }
  0x23   :  { %551 = vmatmul.mubr.bf16.vlgmr.msra.gmra.mxu0 %v701_v1  ;;  %65 = vperm.xlu0 %625, %v754_v4  }
  0x24   :  { %563 = vmatpush3.bf16.msra.mxu0 %v746_v2  ;;  %566 = vmatprep.mubr.msk.bf16.mxu0 %vm700_vm0, %v699_v0 }
  0x25   :  { %564 = vmatprep.subr.bf16.mxu0 %v699_v0  ;;  %627 = vset.pattern.permute.xlu1 %v704_v29 }
  0x26   :  { %77 = vperm.xlu1 %627, %v754_v4  }
  0x27   :  { %629 = vset.pattern.permute.xlu0 %v706_v51 }
  0x28   :  { %565 = vmatpush3.bf16.msra.mxu0 %v749_v3  ;;  %89 = vperm.xlu0 %629, %v754_v4  }
  0x29   :  { %578 = vmatprep.subr.bf16.mxu0 %v699_v0 }
  0x2a   :  { %628 = vset.pattern.permute.xlu1 %v705_v40 }
  0x2b   :  { %83 = vperm.xlu1 %628, %v754_v4  }
  0x2f   :  { %630 = vset.pattern.permute.xlu1 %v707_v62 }
  0x30   :  { %95 = vperm.xlu1 %630, %v754_v4  }
  0x99   :  { %v52_v6 = vpop.permute.xlu0 %51 }
  0x9a   :  { %v58_v8 = vmul.f32 %v771_v7, %v52_v6 }
  0x9b   :  { %v72_v30 = vpop.permute.xlu1 %71 }
  0x9c   :  { %v63_v10 = vadd.f32 %v774_v9, %v58_v8  ;;  %v74_v31 = vmul.f32 %v771_v7, %v72_v30  ;;  %v521_v30 = vld [vmem:[#allocation3 + $0x2] ss:$0 sm:$0xff] }
  0x9e   :  { %v66_v19 = vpop.permute.xlu0 %65  ;;  %v75_v32 = vadd.f32 %v774_v9, %v74_v31 }
  0x9f   :  { %v68_v20 = vmul.f32 %v771_v7, %v66_v19 }
  0xa1   :  { %v69_v21 = vadd.f32 %v774_v9, %v68_v20  ;;  %v78_v41 = vpop.permute.xlu1 %77 }
  0xa2   :  { %v80_v42 = vmul.f32 %v771_v7, %v78_v41 }
  0xa3   :  { %v90_v63 = vpop.permute.xlu0 %89 }
  0xa4   :  { %v81_v43 = vadd.f32 %v774_v9, %v80_v42  ;;  %v92_v1 = vmul.f32 %v771_v7, %v90_v63 }
  0xa6   :  { %v84_v52 = vpop.permute.xlu1 %83  ;;  %v93_v5 = vadd.f32 %v774_v9, %v92_v1 }
  0xa7   :  { %v86_v53 = vmul.f32 %v771_v7, %v84_v52 }
  0xa9   :  { %v87_v54 = vadd.f32 %v774_v9, %v86_v53 }
  0xe3   :  { %v160_v11 = vpop.f32.mrf.mxu0 }
  0xe4   :  { %v166_v12 = vadd.f32 %v160_v11, %v63_v10 }
  0xe5   :  { %v552_v13 = vpop.f32.mrf.mxu0 }
  0xe6   :  { %635 = vtanh.f32 %v166_v12 }
  0xe7   :  { %v163_v14 = vpop.f32.mrf.mxu0 }
  0xe9   :  { %v553_v15 = vpop.f32.mrf.mxu0 }
  0xf3   :  { %v636_v16 = vpop.eup %635 }
  0xf4   :  { %v168_v17 = vpack.c.bf16 %v636_v16, %v636_v16 }
  0xf6   :  { %559 = vmatmul.mubr.msk.bf16.vlgmr.msra.gmra.mxu1 %vm122_vm1, %v168_v17 }
  0xf7   :  { %571 = vmatpush3.bf16.msra.mxu1 %v746_v2  ;;  %574 = vmatprep.mubr.msk.bf16.mxu1 %vm700_vm0, %v699_v0 }
  0xf8   :  { %572 = vmatprep.subr.bf16.mxu1 %v699_v0 }
  0xfb   :  { %573 = vmatpush3.bf16.msra.mxu1 %v749_v3 }
  0xfc   :  { %586 = vmatprep.subr.bf16.mxu1 %v699_v0 }
 0x1b6   :  { %v206_v22 = vpop.f32.mrf.mxu1 }
 0x1b7   :  { %v212_v23 = vadd.f32 %v206_v22, %v69_v21 }
 0x1b8   :  { %v560_v24 = vpop.f32.mrf.mxu1 }
 0x1b9   :  { %637 = vtanh.f32 %v212_v23 }
 0x1ba   :  { %v209_v25 = vpop.f32.mrf.mxu1 }
 0x1bc   :  { %v561_v26 = vpop.f32.mrf.mxu1 }
 0x1c6   :  { %v638_v27 = vpop.eup %637 }
 0x1c7   :  { %v214_v28 = vpack.c.bf16 %v638_v27, %v638_v27 }
 0x1c9   :  { %567 = vmatmul.mubr.msk.bf16.vlgmr.msra.gmra.mxu0 %vm122_vm1, %v214_v28 }
 0x1ca   :  { %579 = vmatpush3.bf16.msra.mxu0 %v746_v2  ;;  %582 = vmatprep.mubr.msk.bf16.mxu0 %vm700_vm0, %v699_v0 }
 0x1cb   :  { %580 = vmatprep.subr.bf16.mxu0 %v699_v0 }
 0x1ce   :  { %581 = vmatpush3.bf16.msra.mxu0 %v749_v3 }
 0x1cf   :  { %594 = vmatprep.subr.bf16.mxu0 %v699_v0 }
 0x289   :  { %v252_v33 = vpop.f32.mrf.mxu0 }
 0x28a   :  { %v258_v34 = vadd.f32 %v252_v33, %v75_v32 }
 0x28b   :  { %v568_v35 = vpop.f32.mrf.mxu0 }
 0x28c   :  { %639 = vtanh.f32 %v258_v34  ;;  %v500_v34 = vstv %s841_s3 }
 0x28d   :  { %v255_v36 = vpop.f32.mrf.mxu0 }
 0x28f   :  { %v569_v37 = vpop.f32.mrf.mxu0 }
 0x299   :  { %v640_v38 = vpop.eup %639 }
 0x29a   :  { %v260_v39 = vpack.c.bf16 %v640_v38, %v640_v38 }
 0x29c   :  { %575 = vmatmul.mubr.msk.bf16.vlgmr.msra.gmra.mxu1 %vm122_vm1, %v260_v39 }
 0x29d   :  { %587 = vmatpush3.bf16.msra.mxu1 %v746_v2  ;;  %590 = vmatprep.mubr.msk.bf16.mxu1 %vm700_vm0, %v699_v0 }
 0x29e   :  { %588 = vmatprep.subr.bf16.mxu1 %v699_v0 }
 0x2a1   :  { %589 = vmatpush3.bf16.msra.mxu1 %v749_v3 }
 0x2a2   :  { %602 = vmatprep.subr.bf16.mxu1 %v699_v0 }
 0x35c   :  { %v298_v44 = vpop.f32.mrf.mxu1 }
 0x35d   :  { %v304_v45 = vadd.f32 %v298_v44, %v81_v43 }
 0x35e   :  { %v576_v46 = vpop.f32.mrf.mxu1 }
 0x35f   :  { %641 = vtanh.f32 %v304_v45 }
 0x360   :  { %v301_v47 = vpop.f32.mrf.mxu1 }
 0x362   :  { %v577_v48 = vpop.f32.mrf.mxu1 }
 0x36c   :  { %v642_v49 = vpop.eup %641 }
 0x36d   :  { %v306_v50 = vpack.c.bf16 %v642_v49, %v642_v49 }
 0x36f   :  { %583 = vmatmul.mubr.msk.bf16.vlgmr.msra.gmra.mxu0 %vm122_vm1, %v306_v50 }
 0x370   :  { %595 = vmatpush3.bf16.msra.mxu0 %v746_v2  ;;  %598 = vmatprep.mubr.msk.bf16.mxu0 %vm700_vm0, %v699_v0 }
 0x371   :  { %596 = vmatprep.subr.bf16.mxu0 %v699_v0 }
 0x374   :  { %597 = vmatpush3.bf16.msra.mxu0 %v749_v3 }
 0x42f   :  { %v344_v55 = vpop.f32.mrf.mxu0 }
 0x430   :  { %v350_v56 = vadd.f32 %v344_v55, %v87_v54 }
 0x431   :  { %v584_v57 = vpop.f32.mrf.mxu0 }
 0x432   :  { %643 = vtanh.f32 %v350_v56 }
 0x433   :  { %v347_v58 = vpop.f32.mrf.mxu0 }
 0x435   :  { %v585_v59 = vpop.f32.mrf.mxu0 }
 0x43f   :  { %v644_v60 = vpop.eup %643 }
 0x440   :  { %v352_v61 = vpack.c.bf16 %v644_v60, %v644_v60 }
 0x442   :  { %591 = vmatmul.mubr.msk.bf16.vlgmr.msra.gmra.mxu1 %vm122_vm1, %v352_v61 }
 0x443   :  { %603 = vmatpush3.bf16.msra.mxu1 %v746_v2  ;;  %606 = vmatprep.mubr.msk.bf16.mxu1 %vm700_vm0, %v699_v0 }
 0x444   :  { %604 = vmatprep.subr.bf16.mxu1 %v699_v0  ;;  %v708_v0 = vmov 7  }
 0x445   :  { %631 = vset.pattern.permute.xlu1 %v708_v0  ;;  %632 = vset.pattern.permute.xlu0 %v708_v0 }
 0x446   :  { %101 = vperm.xlu1 %631, %v754_v4  }
 0x447   :  { %605 = vmatpush3.bf16.msra.mxu1 %v749_v3  ;;  %v96_v3 = vpop.permute.xlu1 %95 }
 0x448   :  { %v98_v14 = vmul.f32 %v771_v7, %v96_v3 }
 0x44a   :  { %v99_v15 = vadd.f32 %v774_v9, %v98_v14 }
 0x4c1   :  { %v102_v23 = vpop.permute.xlu1 %101 }
 0x4c2   :  { %v104_v24 = vmul.f32 %v771_v7, %v102_v23 }
 0x4c4   :  { %v105_v4 = vadd.f32 %v774_v9, %v104_v24 }
 0x502   :  { %v390_v6 = vpop.f32.mrf.mxu1 }
 0x503   :  { %v396_v8 = vadd.f32 %v390_v6, %v93_v5 }
 0x504   :  { %v592_v10 = vpop.f32.mrf.mxu1 }
 0x505   :  { %645 = vtanh.f32 %v396_v8 }
 0x506   :  { %v393_v2 = vpop.f32.mrf.mxu1 }
 0x508   :  { %v593_v11 = vpop.f32.mrf.mxu1 }
 0x512   :  { %v646_v12 = vpop.eup %645 }
 0x513   :  { %v398_v13 = vpack.c.bf16 %v646_v12, %v646_v12 }
 0x515   :  { %599 = vmatmul.mubr.msk.bf16.vlgmr.msra.gmra.mxu0 %vm122_vm1, %v398_v13 }
 0x5d5   :  { %v436_v16 = vpop.f32.mrf.mxu0 }
 0x5d6   :  { %v442_v17 = vadd.f32 %v436_v16, %v99_v15 }
 0x5d7   :  { %v600_v18 = vpop.f32.mrf.mxu0 }
 0x5d8   :  { %647 = vtanh.f32 %v442_v17 }
 0x5d9   :  { %v439_v19 = vpop.f32.mrf.mxu0 }
 0x5db   :  { %v601_v20 = vpop.f32.mrf.mxu0 }
 0x5e5   :  { %v648_v21 = vpop.eup %647 }
 0x5e6   :  { %v444_v22 = vpack.c.bf16 %v648_v21, %v648_v21 }
 0x5e8   :  { %607 = vmatmul.mubr.msk.bf16.vlgmr.msra.gmra.mxu1 %vm122_vm1, %v444_v22 }
 0x6a8   :  { %v482_v25 = vpop.f32.mrf.mxu1 }
 0x6a9   :  { %v488_v26 = vadd.f32 %v482_v25, %v105_v4 }
 0x6aa   :  { %v608_v27 = vpop.f32.mrf.mxu1 }
 0x6ab   :  { %649 = vtanh.f32 %v488_v26 }
 0x6ac   :  { %v485_v28 = vpop.f32.mrf.mxu1 }
 0x6ae   :  { %v609_v29 = vpop.f32.mrf.mxu1 }
 0x6b8   :  { %v650_v31 = vpop.eup %649 }
 0x6b9   :  { %v494_v32 = vmul.f32 %v650_v31, %v521_v30 }
 0x6bb   :  { %v496_v33 = vsel %vm495_vm2, %v494_v32, 0.0 }
 0x6bc   :  { %497 = vadd.xlane.f32.xlu0 %v496_v33 }
 0x745   :  { %v498_v7 = vpop.xlane.xlu0 %497 }
 0x746   :  { %v501_v35 = vadd.f32 %v500_v34, %v498_v7 }
 0x748   :  { %503 = vst.msk [vmem:[%s842_s4] sm:$0x3] %vm502_vm3, %v501_v35 }
 0x749   :  { %508 = vsyncpa [#allocation4], 1 }
 0x74a   :  { %509 = vsyncpa [#allocation6], 1 }

</bundles_post_ra>
